<compile_context>
chip_gen: v7x
topology: tpu7x:2x2x1
jax: 0.10.0
libtpu: 0.0.40
codegen_flags: <defaults>
</compile_context>

<pallas_src>
import functools

import jax
import jax.numpy as jnp
from jax.experimental import pallas as pl
from jax.experimental.pallas import tpu as pltpu


_LANE = 128      # lane width (last dim) of a vreg
_SUBLANE = 8     # sublane count (second-to-last dim) of a vreg


def _round_up(x, m):
    return ((x + m - 1) // m) * m


def _cdiv(a, b):
    return -(-a // b)


def _vmem_budget_bytes():
    """Generation-aware usable-VMEM budget (leaves headroom for compiler scratch)."""
    try:
        cap = int(pltpu.get_tpu_info().vmem_capacity_bytes)
    except Exception:
        cap = 64 << 20                       # conservative default if query fails
    if cap <= (64 << 20):                    # v7x: 64 MiB per TensorCore
        return max(16 << 20, (cap * 3) // 4)  # ~48 MiB: keep 25% headroom
    return min(100 << 20, (cap * 4) // 5)    # v5e / v6e: allow up to ~100 MiB


def _choose_row_tiling(M, tm_cap):
    """Pick (tm, Mp): row-tile size (multiple of 8, <= ~tm_cap) and padded rows.

    * For M > 256 force >= 2 grid steps so both TensorCores get work on v7x.
    * Tile count is chosen so row padding stays below one tile (tight tiling:
      e.g. M=257 no longer pads to 512 rows).
    """
    tm_cap = max(_SUBLANE, (tm_cap // _SUBLANE) * _SUBLANE)
    if M > 256:
        n_tiles = max(2, _cdiv(M, tm_cap))
    elif M > tm_cap:
        n_tiles = _cdiv(M, tm_cap)
    else:
        n_tiles = 1
    tm = _round_up(_cdiv(M, n_tiles), _SUBLANE)
    Mp = _round_up(M, tm)
    return tm, Mp


# ----------------------------------------------------------------------------
# Fused kernel: one grid step = one tile of rows through ALL layers.
# refs = (x_ref, w0, b0, w1, b1, ..., w_{L-1}, b_{L-1}, o_ref)
# ----------------------------------------------------------------------------
def _fused_mlp_kernel(*refs, num_layers, compute_dtype):
    x_ref = refs[0]
    o_ref = refs[-1]
    params = refs[1:-1]

    h = x_ref[...]                               # already in the stream dtype
    for i in range(num_layers):
        w = params[2 * i][...]                   # (Kp_i, Np_i) in compute_dtype
        b = params[2 * i + 1][...]               # (1, Np_i)   in f32
        # MXU matmul in compute_dtype (bf16 fast path), f32 accumulation.
        y = jnp.dot(h.astype(compute_dtype), w,
                    preferred_element_type=jnp.float32)
        y = y + b                                # bias in f32 (VPU, v5e-safe)
        if i < num_layers - 1:
            y = jnp.maximum(y, 0.0)              # ReLU on all but last layer
        h = y
    o_ref[...] = h.astype(o_ref.dtype)


# ----------------------------------------------------------------------------
# Per-layer kernel (guarded fallback for layers too wide to keep resident).
# ----------------------------------------------------------------------------
def _linear_kernel(x_ref, w_ref, b_ref, o_ref, *, apply_relu, compute_dtype):
    y = jnp.dot(x_ref[...].astype(compute_dtype), w_ref[...],
                preferred_element_type=jnp.float32)
    y = y + b_ref[...]
    if apply_relu:
        y = jnp.maximum(y, 0.0)
    o_ref[...] = y.astype(o_ref.dtype)


def _linear_layer(h_pad, w, b, *, apply_relu, compute_dtype, out_dtype,
                  tm, vmem_limit):
    """One Linear(+ReLU) with a (row, N)-tiled grid; K stays whole per block."""
    Mp, Kp = h_pad.shape
    _, Np = w.shape
    w_isz = jnp.dtype(w.dtype).itemsize
    tn = 128
    for cand in (512, 256, 128):
        if Np % cand == 0 and 2 * Kp * cand * w_isz <= vmem_limit // 3:
            tn = cand
            break
    grid = (Mp // tm, Np // tn)
    return pl.pallas_call(
        functools.partial(_linear_kernel, apply_relu=apply_relu,
                          compute_dtype=compute_dtype),
        out_shape=jax.ShapeDtypeStruct((Mp, Np), out_dtype),
        grid=grid,
        in_specs=[pl.BlockSpec((tm, Kp), lambda i, j: (i, 0)),
                  pl.BlockSpec((Kp, tn), lambda i, j: (0, j)),
                  pl.BlockSpec((1, tn), lambda i, j: (0, j))],
        out_specs=pl.BlockSpec((tm, tn), lambda i, j: (i, j)),
        compiler_params=pltpu.CompilerParams(
            dimension_semantics=("parallel", "parallel"),
            vmem_limit_bytes=vmem_limit),
    )(h_pad, w, b)


# ----------------------------------------------------------------------------
# One-time parameter preparation (outside the hot path).
# weights[i]: (out_i, in_i) PyTorch convention, biases[i]: (out_i,)
# ----------------------------------------------------------------------------
def prepare_mlp_params(weights, biases, compute_dtype=jnp.float32,
                       lane_multiple=_LANE):
    """Transpose (out,in)->(in,out), zero-pad to `lane_multiple` and cast once.

    lane_multiple=256 can be used for wide bf16 layers on v6e/v7x (2x256^2 MXU);
    128 minimizes padding and is best for small dims (mem/overhead-bound case).
    """
    dims = [weights[0].shape[1]] + [w.shape[0] for w in weights]
    dims_pad = [_round_up(d, lane_multiple) for d in dims]

    ws, bs = [], []
    for i, (w, b) in enumerate(zip(weights, biases)):
        kp, np_ = dims_pad[i], dims_pad[i + 1]
        w_io = jnp.zeros((kp, np_), compute_dtype)
        w_io = w_io.at[: w.shape[1], : w.shape[0]].set(w.T.astype(compute_dtype))
        b_pad = jnp.zeros((1, np_), jnp.float32)
        b_pad = b_pad.at[0, : b.shape[0]].set(b.astype(jnp.float32))
        ws.append(w_io)
        bs.append(b_pad)
    return ws, bs, dims, dims_pad


# ----------------------------------------------------------------------------
# Forward pass: x (..., input_dim) -> (..., output_dim)
# ----------------------------------------------------------------------------
def mlp_forward(x, padded_weights, padded_biases, dims, dims_pad,
                out_dtype=None, force_fallback=False):
    num_layers = len(padded_weights)
    lead = x.shape[:-1]
    M = 1
    for d in lead:
        M *= d

    K, Kp = dims[0], dims_pad[0]
    Nout, Nout_p = dims[-1], dims_pad[-1]
    compute_dtype = padded_weights[0].dtype
    out_dtype = jnp.dtype(x.dtype if out_dtype is None else out_dtype)

    # Stream the input in the compute dtype when it is narrower (halves input
    # DMA for the bf16 path; ideally the caller already provides x in bf16).
    comp_isz = jnp.dtype(compute_dtype).itemsize
    stream_dtype = compute_dtype if comp_isz < jnp.dtype(x.dtype).itemsize else x.dtype
    s_isz = jnp.dtype(stream_dtype).itemsize

    budget = _vmem_budget_bytes()
    param_bytes = sum(w.size * w.dtype.itemsize + b.size * b.dtype.itemsize
                      for w, b in zip(padded_weights, padded_biases))

    # Guarded fallback: if keeping all padded weights resident would eat too much
    # VMEM (wide layers; mainly v7x's 64 MiB), run layer-by-layer with N tiling.
    use_fallback = force_fallback or (2 * param_bytes > (budget * 6) // 10)

    if use_fallback:
        per_row = 4 * (Kp + max(dims_pad)) + 2 * s_isz * Kp
        tm_cap = min(512, max(_SUBLANE, (budget // 4) // max(1, per_row)))
    else:
        # Double-buffered x/out tiles + f32 intermediates + one cast copy per row;
        # params counted twice in case single-buffering is unavailable.
        per_row = (2 * Kp * s_isz + 2 * Nout_p * out_dtype.itemsize
                   + 4 * sum(dims_pad) + comp_isz * max(dims_pad))
        free = budget - 2 * param_bytes - (2 << 20)
        tm_cap = min(1024, max(_SUBLANE, free // max(1, per_row)))

    tm, Mp = _choose_row_tiling(M, tm_cap)
    grid = (Mp // tm,)

    # Flatten leading dims; pad rows/lanes only when actually needed (each pad is
    # an extra HBM pass). Zero padding is mathematically inert: padded K rows of
    # the weights and padded bias lanes are exactly zero.
    x2d = x.reshape(M, K).astype(stream_dtype)
    if Mp == M and Kp == K:
        x_pad = x2d
    else:
        x_pad = jnp.pad(x2d, ((0, Mp - M), (0, Kp - K)))

    if use_fallback:
        # TODO(synk): extreme input/hidden K would additionally need K tiling with
        # an f32 accumulator over an "arbitrary" reduction axis.
        h = x_pad
        for i, (w, b) in enumerate(zip(padded_weights, padded_biases)):
            last = i == num_layers - 1
            h = _linear_layer(
                h, w, b, apply_relu=not last, compute_dtype=compute_dtype,
                out_dtype=(out_dtype if last else compute_dtype),
                tm=tm, vmem_limit=budget)
        out_pad = h
    else:
        flops = 2 * sum(M * dims[i] * dims[i + 1] for i in range(num_layers))
        bytes_accessed = (x_pad.size * x_pad.dtype.itemsize + param_bytes
                          + Mp * Nout_p * out_dtype.itemsize)
        cost = pl.CostEstimate(flops=flops, transcendentals=0,
                               bytes_accessed=bytes_accessed)
        kernel = functools.partial(_fused_mlp_kernel, num_layers=num_layers,
                                   compute_dtype=compute_dtype)
        operands = [x_pad]
        for w, b in zip(padded_weights, padded_biases):
            operands += [w, b]

        def run(single_buffer_params):
            in_specs = [pl.BlockSpec((tm, Kp), lambda i: (i, 0))]
            for w, b in zip(padded_weights, padded_biases):
                kp, np_ = w.shape
                if single_buffer_params:
                    # Constant index_map across the grid -> single-buffer the
                    # resident weights/biases (halves their VMEM footprint).
                    in_specs.append(pl.BlockSpec((kp, np_), lambda i: (0, 0),
                                                 pipeline_mode=pl.Buffered(1)))
                    in_specs.append(pl.BlockSpec((1, np_), lambda i: (0, 0),
                                                 pipeline_mode=pl.Buffered(1)))
                else:
                    in_specs.append(pl.BlockSpec((kp, np_), lambda i: (0, 0)))
                    in_specs.append(pl.BlockSpec((1, np_), lambda i: (0, 0)))
            return pl.pallas_call(
                kernel,
                out_shape=jax.ShapeDtypeStruct((Mp, Nout_p), out_dtype),
                grid=grid,
                in_specs=in_specs,
                out_specs=pl.BlockSpec((tm, Nout_p), lambda i: (i, 0)),
                compiler_params=pltpu.CompilerParams(
                    dimension_semantics=("parallel",),
                    vmem_limit_bytes=budget),
                cost_estimate=cost,
            )(*operands)

        try:
            out_pad = run(True)
        except Exception:
            # pipeline_mode=pl.Buffered(1) not supported by this jax version:
            # retry with default double-buffered specs (identical math).
            out_pad = run(False)

    # Skip the slicing HBM pass entirely when the shapes are already exact.
    if Mp != M or Nout_p != Nout:
        out_pad = out_pad[:M, :Nout]
    return out_pad.reshape(*lead, Nout)


# ----------------------------------------------------------------------------
# Helpers: deterministic init (nn.Linear-style shapes) and pure-JAX reference.
# ----------------------------------------------------------------------------
def _init_mlp_params(key, input_dim, hidden_dim, output_dim, num_layers):
    hdims = [hidden_dim] * (num_layers - 1)
    in_dims = [input_dim] + hdims
    out_dims = hdims + [output_dim]
    weights, biases = [], []
    for n_in, n_out in zip(in_dims, out_dims):
        key, kw, kb = jax.random.split(key, 3)
        bound = 1.0 / (n_in ** 0.5)
        weights.append(
            jax.random.uniform(kw, (n_out, n_in), jnp.float32, -bound, bound))
        biases.append(
            jax.random.uniform(kb, (n_out,), jnp.float32, -bound, bound))
    return weights, biases


def _mlp_reference(x, weights, biases):
    h = x
    n = len(weights)
    for i, (w, b) in enumerate(zip(weights, biases)):
        h = h @ w.T + b
        if i < n - 1:
            h = jnp.maximum(h, 0.0)
    return h


if __name__ == "__main__":
    key = jax.random.PRNGKey(0)

    # Shapes consistent with the transformer-decoder usage:
    # (num_queries=8, batch=2, input_dim=32) -> hidden 64 -> output 16, 3 layers.
    seq, batch = 8, 2
    input_dim, hidden_dim, output_dim, num_layers = 32, 64, 16, 3

    key, kx = jax.random.split(key)
    x = jax.random.normal(kx, (seq, batch, input_dim), jnp.float32)

    weights, biases = _init_mlp_params(
        key, input_dim, hidden_dim, output_dim, num_layers)
    ref = _mlp_reference(x, weights, biases)

    # ---- f32 MXU path (exact semantics) ----
    pw, pb, dims, dims_pad = prepare_mlp_params(
        weights, biases, compute_dtype=jnp.float32)
    out_f32 = jax.block_until_ready(mlp_forward(x, pw, pb, dims, dims_pad))
    assert out_f32.shape == (seq, batch, output_dim), out_f32.shape
    assert jnp.allclose(out_f32, ref, atol=1e-4, rtol=1e-4), "f32 mismatch"

    # ---- bf16 fast path: bf16 streaming + bf16 output, f32 accumulation ----
    pw16, pb16, dims, dims_pad = prepare_mlp_params(
        weights, biases, compute_dtype=jnp.bfloat16)
    out_bf16 = jax.block_until_ready(
        mlp_forward(x, pw16, pb16, dims, dims_pad, out_dtype=jnp.bfloat16))
    assert out_bf16.shape == (seq, batch, output_dim), out_bf16.shape
    assert out_bf16.dtype == jnp.bfloat16, out_bf16.dtype
    assert jnp.allclose(out_bf16.astype(jnp.float32), ref,
                        atol=5e-2, rtol=5e-2), "bf16 mismatch"

    # ---- multi-tile parallel row grid (M > 256 -> >= 2 tiles, both TCs on v7x) ----
    key, kx2 = jax.random.split(key)
    x_big = jax.random.normal(kx2, (300, batch, input_dim), jnp.float32)
    ref_big = _mlp_reference(x_big, weights, biases)
    out_big = jax.block_until_ready(mlp_forward(x_big, pw, pb, dims, dims_pad))
    assert out_big.shape == (300, batch, output_dim), out_big.shape
    assert jnp.allclose(out_big, ref_big, atol=1e-4, rtol=1e-4), "multi-tile mismatch"

    # ---- guarded layer-by-layer fallback path (wide-layer / v7x safety net) ----
    out_fb = jax.block_until_ready(
        mlp_forward(x, pw, pb, dims, dims_pad, force_fallback=True))
    assert jnp.allclose(out_fb, ref, atol=1e-4, rtol=1e-4), "fallback mismatch"

    print("KERNEL_OK")
</pallas_src>

<mosaic_0001>
module attributes {stable_mosaic.version = 11 : i64} {
  func.func @_fused_mlp_kernel(%arg0: i32, %arg1: memref<16x128xf32, #tpu.memory_space<vmem>>, %arg2: memref<128x128xf32, #tpu.memory_space<vmem>>, %arg3: memref<1x128xf32, #tpu.memory_space<vmem>>, %arg4: memref<128x128xf32, #tpu.memory_space<vmem>>, %arg5: memref<1x128xf32, #tpu.memory_space<vmem>>, %arg6: memref<128x128xf32, #tpu.memory_space<vmem>>, %arg7: memref<1x128xf32, #tpu.memory_space<vmem>>, %arg8: memref<16x128xf32, #tpu.memory_space<vmem>>) attributes {dimension_semantics = [#tpu.dimension_semantics<parallel>], iteration_bounds = array<i64: 1>, scalar_prefetch = 0 : i64, scratch_operands = 0 : i64, tpu.core_type = #tpu.core_type<tc>, window_params = [{transform_indices = @transform_0, window_bounds = array<i64: 16, 128>}, {pipeline_mode = #tpu.pipeline_mode<synchronous>, transform_indices = @transform_1, window_bounds = array<i64: 128, 128>}, {pipeline_mode = #tpu.pipeline_mode<synchronous>, transform_indices = @transform_2, window_bounds = array<i64: 1, 128>}, {pipeline_mode = #tpu.pipeline_mode<synchronous>, transform_indices = @transform_3, window_bounds = array<i64: 128, 128>}, {pipeline_mode = #tpu.pipeline_mode<synchronous>, transform_indices = @transform_4, window_bounds = array<i64: 1, 128>}, {pipeline_mode = #tpu.pipeline_mode<synchronous>, transform_indices = @transform_5, window_bounds = array<i64: 128, 128>}, {pipeline_mode = #tpu.pipeline_mode<synchronous>, transform_indices = @transform_6, window_bounds = array<i64: 1, 128>}, {transform_indices = @transform_7, window_bounds = array<i64: 16, 128>}]} {
    %c0 = arith.constant 0 : index
    %c0_0 = arith.constant 0 : index
    %0 = vector.load %arg1[%c0, %c0_0] : memref<16x128xf32, #tpu.memory_space<vmem>>, vector<16x128xf32>
    %c0_1 = arith.constant 0 : index
    %c0_2 = arith.constant 0 : index
    %1 = vector.load %arg2[%c0_1, %c0_2] : memref<128x128xf32, #tpu.memory_space<vmem>>, vector<128x128xf32>
    %c0_3 = arith.constant 0 : index
    %c0_4 = arith.constant 0 : index
    %2 = vector.load %arg3[%c0_3, %c0_4] : memref<1x128xf32, #tpu.memory_space<vmem>>, vector<1x128xf32>
    %cst = arith.constant dense<0.000000e+00> : vector<16x128xf32>
    %3 = tpu.matmul %0, %1, %cst {dimension_numbers = #tpu.dot_dimension_numbers<[1], [0], [0], [1], [0, 0, 1, 1], [], []>} : vector<16x128xf32>, vector<128x128xf32>, vector<16x128xf32> -> vector<16x128xf32>
    %4 = vector.broadcast %2 : vector<1x128xf32> to vector<16x128xf32>
    %5 = arith.addf %3, %4 : vector<16x128xf32>
    %cst_5 = arith.constant 0.000000e+00 : f32
    %6 = vector.broadcast %cst_5 : f32 to vector<16x128xf32>
    %7 = arith.maximumf %5, %6 : vector<16x128xf32>
    %c0_6 = arith.constant 0 : index
    %c0_7 = arith.constant 0 : index
    %8 = vector.load %arg4[%c0_6, %c0_7] : memref<128x128xf32, #tpu.memory_space<vmem>>, vector<128x128xf32>
    %c0_8 = arith.constant 0 : index
    %c0_9 = arith.constant 0 : index
    %9 = vector.load %arg5[%c0_8, %c0_9] : memref<1x128xf32, #tpu.memory_space<vmem>>, vector<1x128xf32>
    %cst_10 = arith.constant dense<0.000000e+00> : vector<16x128xf32>
    %10 = tpu.matmul %7, %8, %cst_10 {dimension_numbers = #tpu.dot_dimension_numbers<[1], [0], [0], [1], [0, 0, 1, 1], [], []>} : vector<16x128xf32>, vector<128x128xf32>, vector<16x128xf32> -> vector<16x128xf32>
    %11 = vector.broadcast %9 : vector<1x128xf32> to vector<16x128xf32>
    %12 = arith.addf %10, %11 : vector<16x128xf32>
    %cst_11 = arith.constant 0.000000e+00 : f32
    %13 = vector.broadcast %cst_11 : f32 to vector<16x128xf32>
    %14 = arith.maximumf %12, %13 : vector<16x128xf32>
    %c0_12 = arith.constant 0 : index
    %c0_13 = arith.constant 0 : index
    %15 = vector.load %arg6[%c0_12, %c0_13] : memref<128x128xf32, #tpu.memory_space<vmem>>, vector<128x128xf32>
    %c0_14 = arith.constant 0 : index
    %c0_15 = arith.constant 0 : index
    %16 = vector.load %arg7[%c0_14, %c0_15] : memref<1x128xf32, #tpu.memory_space<vmem>>, vector<1x128xf32>
    %cst_16 = arith.constant dense<0.000000e+00> : vector<16x128xf32>
    %17 = tpu.matmul %14, %15, %cst_16 {dimension_numbers = #tpu.dot_dimension_numbers<[1], [0], [0], [1], [0, 0, 1, 1], [], []>} : vector<16x128xf32>, vector<128x128xf32>, vector<16x128xf32> -> vector<16x128xf32>
    %18 = vector.broadcast %16 : vector<1x128xf32> to vector<16x128xf32>
    %19 = arith.addf %17, %18 : vector<16x128xf32>
    %c0_17 = arith.constant 0 : index
    %c0_18 = arith.constant 0 : index
    %20 = vector.load %arg8[%c0_17, %c0_18] : memref<16x128xf32, #tpu.memory_space<vmem>>, vector<16x128xf32>
    tpu.vector_store %arg8[%c0_17, %c0_18], %19 {strides = array<i32>} : memref<16x128xf32, #tpu.memory_space<vmem>>, vector<16x128xf32>,
    return
  }
  func.func @transform_0(%arg0: i32) -> (i32, i32) {
    %c0_i32 = arith.constant 0 : i32
    %c0_i32_0 = arith.constant 0 : i32
    return %arg0, %c0_i32 : i32, i32
  }
  func.func @transform_1(%arg0: i32) -> (i32, i32) {
    %c0_i32 = arith.constant 0 : i32
    %c0_i32_0 = arith.constant 0 : i32
    %c0_i32_1 = arith.constant 0 : i32
    return %c0_i32, %c0_i32_0 : i32, i32
  }
  func.func @transform_2(%arg0: i32) -> (i32, i32) {
    %c0_i32 = arith.constant 0 : i32
    %c0_i32_0 = arith.constant 0 : i32
    %c0_i32_1 = arith.constant 0 : i32
    return %c0_i32, %c0_i32_0 : i32, i32
  }
  func.func @transform_3(%arg0: i32) -> (i32, i32) {
    %c0_i32 = arith.constant 0 : i32
    %c0_i32_0 = arith.constant 0 : i32
    %c0_i32_1 = arith.constant 0 : i32
    return %c0_i32, %c0_i32_0 : i32, i32
  }
  func.func @transform_4(%arg0: i32) -> (i32, i32) {
    %c0_i32 = arith.constant 0 : i32
    %c0_i32_0 = arith.constant 0 : i32
    %c0_i32_1 = arith.constant 0 : i32
    return %c0_i32, %c0_i32_0 : i32, i32
  }
  func.func @transform_5(%arg0: i32) -> (i32, i32) {
    %c0_i32 = arith.constant 0 : i32
    %c0_i32_0 = arith.constant 0 : i32
    %c0_i32_1 = arith.constant 0 : i32
    return %c0_i32, %c0_i32_0 : i32, i32
  }
  func.func @transform_6(%arg0: i32) -> (i32, i32) {
    %c0_i32 = arith.constant 0 : i32
    %c0_i32_0 = arith.constant 0 : i32
    %c0_i32_1 = arith.constant 0 : i32
    return %c0_i32, %c0_i32_0 : i32, i32
  }
  func.func @transform_7(%arg0: i32) -> (i32, i32) {
    %c0_i32 = arith.constant 0 : i32
    %c0_i32_0 = arith.constant 0 : i32
    return %arg0, %c0_i32 : i32, i32
  }
}

module attributes {stable_mosaic.version = 11 : i64} {
  func.func @_fused_mlp_kernel(%arg0: i32, %arg1: memref<16x128xf32, #tpu.memory_space<vmem>>, %arg2: memref<128x128xf32, #tpu.memory_space<vmem>>, %arg3: memref<1x128xf32, #tpu.memory_space<vmem>>, %arg4: memref<128x128xf32, #tpu.memory_space<vmem>>, %arg5: memref<1x128xf32, #tpu.memory_space<vmem>>, %arg6: memref<128x128xf32, #tpu.memory_space<vmem>>, %arg7: memref<1x128xf32, #tpu.memory_space<vmem>>, %arg8: memref<16x128xf32, #tpu.memory_space<vmem>>) attributes {dimension_semantics = [#tpu.dimension_semantics<parallel>], iteration_bounds = array<i64: 1>, scalar_prefetch = 0 : i64, scratch_operands = 0 : i64, tpu.core_type = #tpu.core_type<tc>, window_params = [{transform_indices = @transform_0, window_bounds = array<i64: 16, 128>}, {pipeline_mode = #tpu.pipeline_mode<synchronous>, transform_indices = @transform_1, window_bounds = array<i64: 128, 128>}, {pipeline_mode = #tpu.pipeline_mode<synchronous>, transform_indices = @transform_2, window_bounds = array<i64: 1, 128>}, {pipeline_mode = #tpu.pipeline_mode<synchronous>, transform_indices = @transform_3, window_bounds = array<i64: 128, 128>}, {pipeline_mode = #tpu.pipeline_mode<synchronous>, transform_indices = @transform_4, window_bounds = array<i64: 1, 128>}, {pipeline_mode = #tpu.pipeline_mode<synchronous>, transform_indices = @transform_5, window_bounds = array<i64: 128, 128>}, {pipeline_mode = #tpu.pipeline_mode<synchronous>, transform_indices = @transform_6, window_bounds = array<i64: 1, 128>}, {transform_indices = @transform_7, window_bounds = array<i64: 16, 128>}]} {
    %c0 = arith.constant 0 : index
    %c0_0 = arith.constant 0 : index
    %0 = vector.load %arg1[%c0, %c0_0] : memref<16x128xf32, #tpu.memory_space<vmem>>, vector<16x128xf32>
    %c0_1 = arith.constant 0 : index
    %c0_2 = arith.constant 0 : index
    %1 = vector.load %arg2[%c0_1, %c0_2] : memref<128x128xf32, #tpu.memory_space<vmem>>, vector<128x128xf32>
    %c0_3 = arith.constant 0 : index
    %c0_4 = arith.constant 0 : index
    %2 = vector.load %arg3[%c0_3, %c0_4] : memref<1x128xf32, #tpu.memory_space<vmem>>, vector<1x128xf32>
    %cst = arith.constant dense<0.000000e+00> : vector<16x128xf32>
    %3 = tpu.matmul %0, %1, %cst {dimension_numbers = #tpu.dot_dimension_numbers<[1], [0], [0], [1], [0, 0, 1, 1], [], []>} : vector<16x128xf32>, vector<128x128xf32>, vector<16x128xf32> -> vector<16x128xf32>
    %4 = vector.broadcast %2 : vector<1x128xf32> to vector<16x128xf32>
    %5 = arith.addf %3, %4 : vector<16x128xf32>
    %cst_5 = arith.constant 0.000000e+00 : f32
    %6 = vector.broadcast %cst_5 : f32 to vector<16x128xf32>
    %7 = arith.maximumf %5, %6 : vector<16x128xf32>
    %c0_6 = arith.constant 0 : index
    %c0_7 = arith.constant 0 : index
    %8 = vector.load %arg4[%c0_6, %c0_7] : memref<128x128xf32, #tpu.memory_space<vmem>>, vector<128x128xf32>
    %c0_8 = arith.constant 0 : index
    %c0_9 = arith.constant 0 : index
    %9 = vector.load %arg5[%c0_8, %c0_9] : memref<1x128xf32, #tpu.memory_space<vmem>>, vector<1x128xf32>
    %cst_10 = arith.constant dense<0.000000e+00> : vector<16x128xf32>
    %10 = tpu.matmul %7, %8, %cst_10 {dimension_numbers = #tpu.dot_dimension_numbers<[1], [0], [0], [1], [0, 0, 1, 1], [], []>} : vector<16x128xf32>, vector<128x128xf32>, vector<16x128xf32> -> vector<16x128xf32>
    %11 = vector.broadcast %9 : vector<1x128xf32> to vector<16x128xf32>
    %12 = arith.addf %10, %11 : vector<16x128xf32>
    %cst_11 = arith.constant 0.000000e+00 : f32
    %13 = vector.broadcast %cst_11 : f32 to vector<16x128xf32>
    %14 = arith.maximumf %12, %13 : vector<16x128xf32>
    %c0_12 = arith.constant 0 : index
    %c0_13 = arith.constant 0 : index
    %15 = vector.load %arg6[%c0_12, %c0_13] : memref<128x128xf32, #tpu.memory_space<vmem>>, vector<128x128xf32>
    %c0_14 = arith.constant 0 : index
    %c0_15 = arith.constant 0 : index
    %16 = vector.load %arg7[%c0_14, %c0_15] : memref<1x128xf32, #tpu.memory_space<vmem>>, vector<1x128xf32>
    %cst_16 = arith.constant dense<0.000000e+00> : vector<16x128xf32>
    %17 = tpu.matmul %14, %15, %cst_16 {dimension_numbers = #tpu.dot_dimension_numbers<[1], [0], [0], [1], [0, 0, 1, 1], [], []>} : vector<16x128xf32>, vector<128x128xf32>, vector<16x128xf32> -> vector<16x128xf32>
    %18 = vector.broadcast %16 : vector<1x128xf32> to vector<16x128xf32>
    %19 = arith.addf %17, %18 : vector<16x128xf32>
    %c0_17 = arith.constant 0 : index
    %c0_18 = arith.constant 0 : index
    %20 = vector.load %arg8[%c0_17, %c0_18] : memref<16x128xf32, #tpu.memory_space<vmem>>, vector<16x128xf32>
    tpu.vector_store %arg8[%c0_17, %c0_18], %19 {strides = array<i32>} : memref<16x128xf32, #tpu.memory_space<vmem>>, vector<16x128xf32>,
    return
  }
  func.func @transform_0(%arg0: i32) -> (i32, i32) {
    %c0_i32 = arith.constant 0 : i32
    %c0_i32_0 = arith.constant 0 : i32
    return %arg0, %c0_i32 : i32, i32
  }
  func.func @transform_1(%arg0: i32) -> (i32, i32) {
    %c0_i32 = arith.constant 0 : i32
    %c0_i32_0 = arith.constant 0 : i32
    %c0_i32_1 = arith.constant 0 : i32
    return %c0_i32, %c0_i32_0 : i32, i32
  }
  func.func @transform_2(%arg0: i32) -> (i32, i32) {
    %c0_i32 = arith.constant 0 : i32
    %c0_i32_0 = arith.constant 0 : i32
    %c0_i32_1 = arith.constant 0 : i32
    return %c0_i32, %c0_i32_0 : i32, i32
  }
  func.func @transform_3(%arg0: i32) -> (i32, i32) {
    %c0_i32 = arith.constant 0 : i32
    %c0_i32_0 = arith.constant 0 : i32
    %c0_i32_1 = arith.constant 0 : i32
    return %c0_i32, %c0_i32_0 : i32, i32
  }
  func.func @transform_4(%arg0: i32) -> (i32, i32) {
    %c0_i32 = arith.constant 0 : i32
    %c0_i32_0 = arith.constant 0 : i32
    %c0_i32_1 = arith.constant 0 : i32
    return %c0_i32, %c0_i32_0 : i32, i32
  }
  func.func @transform_5(%arg0: i32) -> (i32, i32) {
    %c0_i32 = arith.constant 0 : i32
    %c0_i32_0 = arith.constant 0 : i32
    %c0_i32_1 = arith.constant 0 : i32
    return %c0_i32, %c0_i32_0 : i32, i32
  }
  func.func @transform_6(%arg0: i32) -> (i32, i32) {
    %c0_i32 = arith.constant 0 : i32
    %c0_i32_0 = arith.constant 0 : i32
    %c0_i32_1 = arith.constant 0 : i32
    return %c0_i32, %c0_i32_0 : i32, i32
  }
  func.func @transform_7(%arg0: i32) -> (i32, i32) {
    %c0_i32 = arith.constant 0 : i32
    %c0_i32_0 = arith.constant 0 : i32
    return %arg0, %c0_i32 : i32, i32
  }
}

</mosaic_0001>

<bundles_post_ra>
// kernel: tpu_custom_call.1
= control target key start
LH: loop header
LB: loop body
LE: loop exit
PB: predicated region body
PF: predicated region fallthrough
CT: control target
= control target key end

     0   :  { %12 = vsyncpa [#allocation3], 0  ;;  %s931_s0 = inlined_call_operand.hbm [shape: f32[16,128], index: 0, kind: input, shape index: {}]   ;;  %s932_s1 = inlined_call_operand.hbm [shape: f32[128,128], index: 1, kind: input, shape index: {}]   ;;  %s933_s2 = inlined_call_operand.vmem [shape: f32[1,128], index: 2, kind: input, shape index: {}]   ;;  %s934_s3 = inlined_call_operand.hbm [shape: f32[128,128], index: 3, kind: input, shape index: {}]   ;;  %s935_s4 = inlined_call_operand.vmem [shape: f32[1,128], index: 4, kind: input, shape index: {}]   ;;  %s936_s5 = inlined_call_operand.hbm [shape: f32[128,128], index: 5, kind: input, shape index: {}]   ;;  %s937_s6 = inlined_call_operand.vmem [shape: f32[1,128], index: 6, kind: input, shape index: {}]   ;;  %s938_s7 = inlined_call_operand.hbm [shape: f32[16,128], index: 7, kind: output, shape index: {}]  }
   0x1   :  { %13 = vsyncpa [#allocation6], 0 }
   0x2   :  { %14 = vsyncpa [#allocation9], 0 }
   0x3   :  { %15 = vsyncpa [#allocation4], 0  ;;  %s786_s24 = smov [#allocation5]   ;;  %s787_s26 = smov [#allocation2]  }
   0x4   :  { %s33_s25 = sshll.u32 %s786_s24, 4  ;;  %s21_s27 = sshll.u32 %s787_s26, 4  ;;  %s34_s25 = int_to_ptr.vmem [resolvable:$true] %s33_s25  ;;  %s833_s27 = int_to_ptr.vmem [resolvable:$true] %s21_s27 }
   0x5   :  { %s668_s30 = scalar_lea.hbm %s932_s1, 2048 }
   0x6   :  { %p669_p0 = scmp.ne.s32.totalorder %s932_s1, %s668_s30  ;;  %p672_p1 = scmp.lt.u32.totalorder %s668_s30, %s932_s1 }
   0x8   :  { %p674_p2 = pnand %p672_p1, %p669_p0 }
   0xa   :  { %677 = shalt.err (!%p674_p2)
}
   0xb   :  { %s678_s12 = scalar_lea.vmem %s34_s25, 2048  ;;  %p683_p4 = scmp.lt.s32.totalorder %s34_s25, %s34_s25 }
   0xc   :  { %p679_p3 = scmp.ne.s32.totalorder %s34_s25, %s678_s12  ;;  %p684_p5 = scmp.lt.s32.totalorder %s678_s12, %s678_s12 }
   0xe   :  { %p685_p6 = por %p684_p5, %p683_p4 }
  0x10   :  { %p686_p7 = pnand %p685_p6, %p679_p3 }
  0x12   :  { %689 = shalt.err (!%p686_p7)
}
  0x13   :  { %s788_s13 = smov 128   ;;  %s789_s14 = smov 8  }
  0x14   :  { %39 = dma.hbm_to_vmem [thread:$0]  %s932_s1, 2048, %s34_s25, [#allocation6], %s788_s13, %s788_s13, %s789_s14  }
  0x15   :  { %s690_s19 = scalar_lea.hbm %s931_s0, 256 }
  0x16   :  { %p691_p8 = scmp.ne.s32.totalorder %s931_s0, %s690_s19  ;;  %p694_p9 = scmp.lt.u32.totalorder %s690_s19, %s931_s0 }
  0x18   :  { %p696_p10 = pnand %p694_p9, %p691_p8 }
  0x1a   :  { %699 = shalt.err (!%p696_p10)
}
  0x1b   :  { %s700_s24 = scalar_lea.vmem %s833_s27, 256  ;;  %p705_p12 = scmp.lt.s32.totalorder %s833_s27, %s833_s27 }
  0x1c   :  { %p701_p11 = scmp.ne.s32.totalorder %s833_s27, %s700_s24  ;;  %p706_p13 = scmp.lt.s32.totalorder %s700_s24, %s700_s24 }
  0x1e   :  { %p707_p0 = por %p706_p13, %p705_p12 }
  0x20   :  { %p708_p1 = pnand %p707_p0, %p701_p11 }
  0x22   :  { %711 = shalt.err (!%p708_p1)
}
  0x23   :  { %27 = dma.hbm_to_vmem [thread:$0]  %s931_s0, 256, %s833_s27, [#allocation3], %s788_s13, %s788_s13, %s789_s14  }
  0x24   :  { %s790_s26 = smov [#allocation7]   ;;  %s791_s29 = smov [#allocation8]  }
  0x25   :  { %s47_s28 = sshll.u32 %s790_s26, 4  ;;  %s61_s30 = sshll.u32 %s791_s29, 4  ;;  %s48_s28 = int_to_ptr.vmem [resolvable:$true] %s47_s28  ;;  %s870_s30 = int_to_ptr.vmem [resolvable:$true] %s61_s30 }
  0x26   :  { %s712_s10 = scalar_lea.hbm %s934_s3, 2048 }
  0x27   :  { %p713_p2 = scmp.ne.s32.totalorder %s934_s3, %s712_s10  ;;  %p716_p3 = scmp.lt.u32.totalorder %s712_s10, %s934_s3 }
  0x29   :  { %p718_p4 = pnand %p716_p3, %p713_p2 }
  0x2b   :  { %721 = shalt.err (!%p718_p4)
}
  0x2c   :  { %s722_s0 = scalar_lea.vmem %s48_s28, 2048  ;;  %p727_p6 = scmp.lt.s32.totalorder %s48_s28, %s48_s28 }
  0x2d   :  { %p723_p5 = scmp.ne.s32.totalorder %s48_s28, %s722_s0  ;;  %p728_p7 = scmp.lt.s32.totalorder %s722_s0, %s722_s0 }
  0x2f   :  { %p729_p8 = por %p728_p7, %p727_p6 }
  0x31   :  { %p730_p9 = pnand %p729_p8, %p723_p5 }
  0x33   :  { %733 = shalt.err (!%p730_p9)
}
  0x34   :  { %53 = dma.hbm_to_vmem [thread:$0]  %s934_s3, 2048, %s48_s28, [#allocation6], %s788_s13, %s788_s13, %s789_s14  }
  0x35   :  { %s734_s20 = scalar_lea.hbm %s936_s5, 2048 }
  0x36   :  { %p735_p10 = scmp.ne.s32.totalorder %s936_s5, %s734_s20  ;;  %p738_p11 = scmp.lt.u32.totalorder %s734_s20, %s936_s5 }
  0x38   :  { %p740_p12 = pnand %p738_p11, %p735_p10 }
  0x3a   :  { %743 = shalt.err (!%p740_p12)
}
  0x3b   :  { %s744_s1 = scalar_lea.vmem %s870_s30, 2048  ;;  %p749_p0 = scmp.lt.s32.totalorder %s870_s30, %s870_s30 }
  0x3c   :  { %p745_p13 = scmp.ne.s32.totalorder %s870_s30, %s744_s1  ;;  %p750_p1 = scmp.lt.s32.totalorder %s744_s1, %s744_s1 }
  0x3e   :  { %p751_p2 = por %p750_p1, %p749_p0 }
  0x40   :  { %p752_p3 = pnand %p751_p2, %p745_p13 }
  0x42   :  { %755 = shalt.err (!%p752_p3)
}
  0x43   :  { %67 = dma.hbm_to_vmem [thread:$0]  %s936_s5, 2048, %s870_s30, [#allocation9], %s788_s13, %s788_s13, %s789_s14  }
  0x44   :  { %778 = dma.done.wait [#allocation3], 256  }
  0x45   :  { %779 = vsyncadd [#allocation3], 4294967040 }
  0x46   :  { %780 = dma.done.wait [#allocation6], 4096  }
  0x47   :  { %781 = vsyncadd [#allocation6], 4294963200 }
  0x48   :  { %782 = dma.done.wait [#allocation9], 2048  }
  0x49   :  { %783 = vsyncadd [#allocation9], 4294965248  ;;  %v84_v0 = vld [vmem:[#allocation5] sm:$0xff]  ;;  %v85_v1 = vld [vmem:[#allocation5 + $0x8] sm:$0xff]  ;;  %s792_s8 = smov [#allocation10]  }
  0x4a   :  { %v86_v2 = vld [vmem:[#allocation5 + $0x10] sm:$0xff]  ;;  %v565_v3 = vpack.c.bf16 %v85_v1, %v84_v0  ;;  %v87_v4 = vld [vmem:[#allocation5 + $0x18] sm:$0xff]  ;;  %v88_v6 = vld [vmem:[#allocation5 + $0x20] sm:$0xff]  ;;  %s389_s9 = sshll.u32 %s792_s8, 4  ;;  %s390_s9 = int_to_ptr.vmem [resolvable:$true] %s389_s9 }
  0x4b   :  { %v569_v5 = vpack.c.bf16 %v87_v4, %v86_v2  ;;  %v89_v7 = vld [vmem:[#allocation5 + $0x28] sm:$0xff]  ;;  %v90_v9 = vld [vmem:[#allocation5 + $0x30] sm:$0xff]  ;;  %v91_v10 = vld [vmem:[#allocation5 + $0x38] sm:$0xff]  ;;  %p761_p5 = scmp.lt.s32.totalorder %s390_s9, %s390_s9 }
  0x4c   :  { %566 = vmatprep.subr.bf16.mxu0 %v565_v3  ;;  %v573_v8 = vpack.c.bf16 %v89_v7, %v88_v6  ;;  %v82_v11 = vld [vmem:[#allocation2] sm:$0xff]  ;;  %v184_v12 = vld [vmem:[#allocation7] sm:$0xff]  ;;  %v185_v13 = vld [vmem:[#allocation7 + $0x8] sm:$0xff]  ;;  %v577_v20 = vpack.c.bf16 %v91_v10, %v90_v9 }
  0x4d   :  { %568 = vmatpush3.bf16.msra.mxu0 %v565_v3  ;;  %492 = vmatprep.mubr.f32.mxu0 %v82_v11  ;;  %v186_v14 = vld [vmem:[#allocation7 + $0x10] sm:$0xff]  ;;  %v597_v15 = vpack.c.bf16 %v185_v13, %v184_v12  ;;  %v187_v16 = vld [vmem:[#allocation7 + $0x18] sm:$0xff]  ;;  %v188_v18 = vld [vmem:[#allocation7 + $0x20] sm:$0xff] }
  0x4e   :  { %570 = vmatprep.subr.bf16.mxu0 %v569_v5  ;;  %v601_v17 = vpack.c.bf16 %v187_v16, %v186_v14  ;;  %v189_v19 = vld [vmem:[#allocation7 + $0x28] sm:$0xff]  ;;  %v92_v21 = vld [vmem:[#allocation5 + $0x40] sm:$0xff]  ;;  %v190_v24 = vld [vmem:[#allocation7 + $0x30] sm:$0xff] }
  0x4f   :  { %598 = vmatprep.subr.bf16.mxu1 %v597_v15  ;;  %v93_v22 = vld [vmem:[#allocation5 + $0x48] sm:$0xff]  ;;  %v605_v23 = vpack.c.bf16 %v189_v19, %v188_v18  ;;  %v191_v25 = vld [vmem:[#allocation7 + $0x38] sm:$0xff]  ;;  %v94_v27 = vld [vmem:[#allocation5 + $0x50] sm:$0xff] }
  0x50   :  { %600 = vmatpush3.bf16.msra.mxu1 %v597_v15  ;;  %v581_v26 = vpack.c.bf16 %v93_v22, %v92_v21  ;;  %v95_v28 = vld [vmem:[#allocation5 + $0x58] sm:$0xff]  ;;  %v609_v29 = vpack.c.bf16 %v191_v25, %v190_v24  ;;  %v192_v30 = vld [vmem:[#allocation7 + $0x40] sm:$0xff]  ;;  %v193_v31 = vld [vmem:[#allocation7 + $0x48] sm:$0xff] }
  0x51   :  { %572 = vmatpush3.bf16.msra.mxu0 %v569_v5  ;;  %602 = vmatprep.subr.bf16.mxu1 %v601_v17  ;;  %v585_v32 = vpack.c.bf16 %v95_v28, %v94_v27  ;;  %v96_v33 = vld [vmem:[#allocation5 + $0x60] sm:$0xff]  ;;  %v97_v34 = vld [vmem:[#allocation5 + $0x68] sm:$0xff]  ;;  %v613_v35 = vpack.c.bf16 %v193_v31, %v192_v30  ;;  %v194_v36 = vld [vmem:[#allocation7 + $0x50] sm:$0xff] }
  0x52   :  { %574 = vmatprep.subr.bf16.mxu0 %v573_v8  ;;  %v195_v37 = vld [vmem:[#allocation7 + $0x58] sm:$0xff]  ;;  %v589_v38 = vpack.c.bf16 %v97_v34, %v96_v33  ;;  %v98_v39 = vld [vmem:[#allocation5 + $0x70] sm:$0xff]  ;;  %v196_v42 = vld [vmem:[#allocation7 + $0x60] sm:$0xff] }
  0x53   :  { %v99_v40 = vld [vmem:[#allocation5 + $0x78] sm:$0xff]  ;;  %v617_v41 = vpack.c.bf16 %v195_v37, %v194_v36  ;;  %v197_v43 = vld [vmem:[#allocation7 + $0x68] sm:$0xff]  ;;  %v198_v47 = vld [vmem:[#allocation7 + $0x70] sm:$0xff] }
  0x54   :  { %604 = vmatpush3.bf16.msra.mxu1 %v601_v17  ;;  %v593_v44 = vpack.c.bf16 %v99_v40, %v98_v39  ;;  %v621_v45 = vpack.c.bf16 %v197_v43, %v196_v42  ;;  %v83_v46 = vld [vmem:[#allocation2 + $0x8] sm:$0xff]  ;;  %v284_v50 = vld [vmem:[#allocation8] sm:$0xff]  ;;  %v285_v51 = vld [vmem:[#allocation8 + $0x8] sm:$0xff] }
  0x55   :  { %576 = vmatpush3.bf16.msra.mxu0 %v573_v8  ;;  %606 = vmatprep.subr.bf16.mxu1 %v605_v23  ;;  %v199_v48 = vld [vmem:[#allocation7 + $0x78] sm:$0xff]  ;;  %v286_v52 = vld [vmem:[#allocation8 + $0x10] sm:$0xff]  ;;  %v629_v53 = vpack.c.bf16 %v285_v51, %v284_v50  ;;  %v288_v56 = vld [vmem:[#allocation8 + $0x20] sm:$0xff] }
  0x56   :  { %578 = vmatprep.subr.bf16.mxu0 %v577_v20  ;;  %v625_v49 = vpack.c.bf16 %v199_v48, %v198_v47  ;;  %v287_v54 = vld [vmem:[#allocation8 + $0x18] sm:$0xff]  ;;  %v289_v57 = vld [vmem:[#allocation8 + $0x28] sm:$0xff]  ;;  %v290_v59 = vld [vmem:[#allocation8 + $0x30] sm:$0xff] }
  0x57   :  { %v633_v55 = vpack.c.bf16 %v287_v54, %v286_v52  ;;  %v637_v58 = vpack.c.bf16 %v289_v57, %v288_v56  ;;  %v291_v60 = vld [vmem:[#allocation8 + $0x38] sm:$0xff]  ;;  %v292_v62 = vld [vmem:[#allocation8 + $0x40] sm:$0xff]  ;;  %v293_v63 = vld [vmem:[#allocation8 + $0x48] sm:$0xff] }
  0x58   :  { %608 = vmatpush3.bf16.msra.mxu1 %v605_v23  ;;  %v641_v61 = vpack.c.bf16 %v291_v60, %v290_v59  ;;  %v645_v0 = vpack.c.bf16 %v293_v63, %v292_v62  ;;  %v294_v1 = vld [vmem:[#allocation8 + $0x50] sm:$0xff]  ;;  %v295_v2 = vld [vmem:[#allocation8 + $0x58] sm:$0xff]  ;;  %v296_v4 = vld [vmem:[#allocation8 + $0x60] sm:$0xff] }
  0x59   :  { %580 = vmatpush3.bf16.msra.mxu0 %v577_v20  ;;  %610 = vmatprep.subr.bf16.mxu1 %v609_v29  ;;  %v649_v3 = vpack.c.bf16 %v295_v2, %v294_v1  ;;  %v297_v5 = vld [vmem:[#allocation8 + $0x68] sm:$0xff]  ;;  %v403_v7 = vld [vmem:[%s933_s2] ss:$0 sm:$0xff]  ;;  %v299_v15 = vld [vmem:[#allocation8 + $0x78] sm:$0xff] }
  0x5a   :  { %582 = vmatprep.subr.bf16.mxu0 %v581_v26  ;;  %v653_v6 = vpack.c.bf16 %v297_v5, %v296_v4  ;;  %v298_v14 = vld [vmem:[#allocation8 + $0x70] sm:$0xff] }
  0x5b   :  { %v657_v16 = vpack.c.bf16 %v299_v15, %v298_v14  ;;  %v404_v17 = vld [vmem:[%s935_s4] ss:$0 sm:$0xff]  ;;  %s756_s4 = scalar_lea.vmem %s390_s9, 256 }
  0x5c   :  { %612 = vmatpush3.bf16.msra.mxu1 %v609_v29  ;;  %v405_v24 = vld [vmem:[%s937_s6] ss:$0 sm:$0xff]  ;;  %p757_p4 = scmp.ne.s32.totalorder %s390_s9, %s756_s4  ;;  %p762_p6 = scmp.lt.s32.totalorder %s756_s4, %s756_s4 }
  0x5d   :  { %584 = vmatpush3.bf16.msra.mxu0 %v581_v26  ;;  %614 = vmatprep.subr.bf16.mxu1 %v613_v35 }
  0x5e   :  { %586 = vmatprep.subr.bf16.mxu0 %v585_v32  ;;  %p763_p7 = por %p762_p6, %p761_p5 }
  0x60   :  { %616 = vmatpush3.bf16.msra.mxu1 %v613_v35  ;;  %p764_p8 = pnand %p763_p7, %p757_p4 }
  0x61   :  { %588 = vmatpush3.bf16.msra.mxu0 %v585_v32  ;;  %618 = vmatprep.subr.bf16.mxu1 %v617_v41 }
  0x62   :  { %590 = vmatprep.subr.bf16.mxu0 %v589_v38 }
  0x64   :  { %620 = vmatpush3.bf16.msra.mxu1 %v617_v41 }
  0x65   :  { %592 = vmatpush3.bf16.msra.mxu0 %v589_v38  ;;  %622 = vmatprep.subr.bf16.mxu1 %v621_v45 }
  0x66   :  { %594 = vmatprep.subr.bf16.mxu0 %v593_v44 }
  0x68   :  { %624 = vmatpush3.bf16.msra.mxu1 %v621_v45 }
  0x69   :  { %596 = vmatpush3.bf16.msra.mxu0 %v593_v44  ;;  %626 = vmatprep.subr.bf16.mxu1 %v625_v49 }
  0x6a   :  { %630 = vmatprep.subr.bf16.mxu0 %v629_v53 }
  0x6c   :  { %493 = vmatmul.mubr.f32.vlgmr.msra.gmra.mrb[0].mxu0 %v83_v46  ;;  %628 = vmatpush3.bf16.msra.mxu1 %v625_v49 }
  0x6d   :  { %632 = vmatpush3.bf16.msra.mxu0 %v629_v53 }
  0x6e   :  { %634 = vmatprep.subr.bf16.mxu0 %v633_v55 }
  0x71   :  { %636 = vmatpush3.bf16.msra.mxu0 %v633_v55 }
  0x72   :  { %638 = vmatprep.subr.bf16.mxu0 %v637_v58 }
  0x75   :  { %640 = vmatpush3.bf16.msra.mxu0 %v637_v58 }
  0x76   :  { %642 = vmatprep.subr.bf16.mxu0 %v641_v61 }
  0x79   :  { %644 = vmatpush3.bf16.msra.mxu0 %v641_v61 }
  0x7a   :  { %646 = vmatprep.subr.bf16.mxu0 %v645_v0 }
  0x7d   :  { %648 = vmatpush3.bf16.msra.mxu0 %v645_v0 }
  0x7e   :  { %650 = vmatprep.subr.bf16.mxu0 %v649_v3 }
  0x81   :  { %652 = vmatpush3.bf16.msra.mxu0 %v649_v3 }
  0x82   :  { %654 = vmatprep.subr.bf16.mxu0 %v653_v6 }
  0x85   :  { %656 = vmatpush3.bf16.msra.mxu0 %v653_v6 }
  0x86   :  { %658 = vmatprep.subr.bf16.mxu0 %v657_v16 }
  0x89   :  { %660 = vmatpush3.bf16.msra.mxu0 %v657_v16 }
 0x13f   :  { %v494_v8 = vpop.f32.mrb[0].mxu0 }
 0x140   :  { %v179_v9 = vadd.f32 %v494_v8, %v403_v7  ;;  %v173_v10 = vpop.f32.mrb[1].mxu0 }
 0x141   :  { %v174_v11 = vadd.f32 %v403_v7, %v173_v10 }
 0x142   :  { %v183_v13 = vmax.f32 %v179_v9, 0.0 }
 0x143   :  { %v182_v12 = vmax.f32 %v174_v11, 0.0 }
 0x145   :  { %527 = vmatprep.mubr.f32.mxu1 %v182_v12 }
 0x146   :  { %528 = vmatmul.mubr.f32.vlgmr.msra.gmra.mrb[0].mxu1 %v183_v13 }
 0x219   :  { %v529_v18 = vpop.f32.mrb[0].mxu1 }
 0x21a   :  { %v279_v19 = vadd.f32 %v529_v18, %v404_v17  ;;  %v273_v20 = vpop.f32.mrb[1].mxu1 }
 0x21b   :  { %v274_v21 = vadd.f32 %v404_v17, %v273_v20 }
 0x21c   :  { %v283_v23 = vmax.f32 %v279_v19, 0.0 }
 0x21d   :  { %v282_v22 = vmax.f32 %v274_v21, 0.0 }
 0x21f   :  { %562 = vmatprep.mubr.f32.mxu0 %v282_v22 }
 0x220   :  { %563 = vmatmul.mubr.f32.vlgmr.msra.gmra.mrb[2].mxu0 %v283_v23 }
 0x2f3   :  { %v564_v25 = vpop.f32.mrb[2].mxu0 }
 0x2f4   :  { %v379_v26 = vadd.f32 %v564_v25, %v405_v24  ;;  %v373_v27 = vpop.f32.mrb[3].mxu0 }
 0x2f5   :  { %v374_v28 = vadd.f32 %v405_v24, %v373_v27 }
 0x2f6   :  { %383 = vst [vmem:[#allocation10 + $0x8] sm:$0xff] %v379_v26 }
 0x2f7   :  { %382 = vst [vmem:[#allocation10] sm:$0xff] %v374_v28 }
 0x2f8   :  { %767 = shalt.err (!%p764_p8)
}
 0x2f9   :  { %s768_s6 = scalar_lea.hbm %s938_s7, 256 }
 0x2fa   :  { %p769_p9 = scmp.ne.s32.totalorder %s938_s7, %s768_s6  ;;  %p772_p10 = scmp.lt.u32.totalorder %s768_s6, %s938_s7 }
 0x2fc   :  { %p774_p11 = pnand %p772_p10, %p769_p9 }
 0x2fe   :  { %777 = shalt.err (!%p774_p11)
}
 0x2ff   :  { %395 = dma.vmem_to_hbm [thread:$0]  %s390_s9, 256, %s938_s7, [#allocation4], %s788_s13, %s788_s13, %s789_s14  }
 0x300   :  { %784 = dma.done.wait [#allocation4], 256  }
 0x301   :  { %785 = vsyncadd [#allocation4], 4294967040 }
 0x302   :  { %399 = vsyncpa [#allocation3], 1 }
 0x303   :  { %400 = vsyncpa [#allocation6], 1 }
 0x304   :  { %401 = vsyncpa [#allocation9], 1 }
 0x305   :  { %402 = vsyncpa [#allocation4], 1 }

// kernel: tpu_custom_call.1
= control target key start
LH: loop header
LB: loop body
LE: loop exit
PB: predicated region body
PF: predicated region fallthrough
CT: control target
= control target key end

     0   :  { %12 = vsyncpa [#allocation3], 0  ;;  %s931_s0 = inlined_call_operand.hbm [shape: f32[16,128], index: 0, kind: input, shape index: {}]   ;;  %s932_s1 = inlined_call_operand.hbm [shape: f32[128,128], index: 1, kind: input, shape index: {}]   ;;  %s933_s2 = inlined_call_operand.vmem [shape: f32[1,128], index: 2, kind: input, shape index: {}]   ;;  %s934_s3 = inlined_call_operand.hbm [shape: f32[128,128], index: 3, kind: input, shape index: {}]   ;;  %s935_s4 = inlined_call_operand.vmem [shape: f32[1,128], index: 4, kind: input, shape index: {}]   ;;  %s936_s5 = inlined_call_operand.hbm [shape: f32[128,128], index: 5, kind: input, shape index: {}]   ;;  %s937_s6 = inlined_call_operand.vmem [shape: f32[1,128], index: 6, kind: input, shape index: {}]   ;;  %s938_s7 = inlined_call_operand.hbm [shape: f32[16,128], index: 7, kind: output, shape index: {}]  }
   0x1   :  { %13 = vsyncpa [#allocation6], 0 }
   0x2   :  { %14 = vsyncpa [#allocation9], 0 }
   0x3   :  { %15 = vsyncpa [#allocation4], 0  ;;  %s786_s24 = smov [#allocation5]   ;;  %s787_s26 = smov [#allocation2]  }
   0x4   :  { %s33_s25 = sshll.u32 %s786_s24, 4  ;;  %s21_s27 = sshll.u32 %s787_s26, 4  ;;  %s34_s25 = int_to_ptr.vmem [resolvable:$true] %s33_s25  ;;  %s833_s27 = int_to_ptr.vmem [resolvable:$true] %s21_s27 }
   0x5   :  { %s668_s30 = scalar_lea.hbm %s932_s1, 2048 }
   0x6   :  { %p669_p0 = scmp.ne.s32.totalorder %s932_s1, %s668_s30  ;;  %p672_p1 = scmp.lt.u32.totalorder %s668_s30, %s932_s1 }
   0x8   :  { %p674_p2 = pnand %p672_p1, %p669_p0 }
   0xa   :  { %677 = shalt.err (!%p674_p2)
}
   0xb   :  { %s678_s12 = scalar_lea.vmem %s34_s25, 2048  ;;  %p683_p4 = scmp.lt.s32.totalorder %s34_s25, %s34_s25 }
   0xc   :  { %p679_p3 = scmp.ne.s32.totalorder %s34_s25, %s678_s12  ;;  %p684_p5 = scmp.lt.s32.totalorder %s678_s12, %s678_s12 }
   0xe   :  { %p685_p6 = por %p684_p5, %p683_p4 }
  0x10   :  { %p686_p7 = pnand %p685_p6, %p679_p3 }
  0x12   :  { %689 = shalt.err (!%p686_p7)
}
  0x13   :  { %s788_s13 = smov 128   ;;  %s789_s14 = smov 8  }
  0x14   :  { %39 = dma.hbm_to_vmem [thread:$0]  %s932_s1, 2048, %s34_s25, [#allocation6], %s788_s13, %s788_s13, %s789_s14  }
  0x15   :  { %s690_s19 = scalar_lea.hbm %s931_s0, 256 }
  0x16   :  { %p691_p8 = scmp.ne.s32.totalorder %s931_s0, %s690_s19  ;;  %p694_p9 = scmp.lt.u32.totalorder %s690_s19, %s931_s0 }
  0x18   :  { %p696_p10 = pnand %p694_p9, %p691_p8 }
  0x1a   :  { %699 = shalt.err (!%p696_p10)
}
  0x1b   :  { %s700_s24 = scalar_lea.vmem %s833_s27, 256  ;;  %p705_p12 = scmp.lt.s32.totalorder %s833_s27, %s833_s27 }
  0x1c   :  { %p701_p11 = scmp.ne.s32.totalorder %s833_s27, %s700_s24  ;;  %p706_p13 = scmp.lt.s32.totalorder %s700_s24, %s700_s24 }
  0x1e   :  { %p707_p0 = por %p706_p13, %p705_p12 }
  0x20   :  { %p708_p1 = pnand %p707_p0, %p701_p11 }
  0x22   :  { %711 = shalt.err (!%p708_p1)
}
  0x23   :  { %27 = dma.hbm_to_vmem [thread:$0]  %s931_s0, 256, %s833_s27, [#allocation3], %s788_s13, %s788_s13, %s789_s14  }
  0x24   :  { %s790_s26 = smov [#allocation7]   ;;  %s791_s29 = smov [#allocation8]  }
  0x25   :  { %s47_s28 = sshll.u32 %s790_s26, 4  ;;  %s61_s30 = sshll.u32 %s791_s29, 4  ;;  %s48_s28 = int_to_ptr.vmem [resolvable:$true] %s47_s28  ;;  %s870_s30 = int_to_ptr.vmem [resolvable:$true] %s61_s30 }
  0x26   :  { %s712_s10 = scalar_lea.hbm %s934_s3, 2048 }
  0x27   :  { %p713_p2 = scmp.ne.s32.totalorder %s934_s3, %s712_s10  ;;  %p716_p3 = scmp.lt.u32.totalorder %s712_s10, %s934_s3 }
  0x29   :  { %p718_p4 = pnand %p716_p3, %p713_p2 }
  0x2b   :  { %721 = shalt.err (!%p718_p4)
}
  0x2c   :  { %s722_s0 = scalar_lea.vmem %s48_s28, 2048  ;;  %p727_p6 = scmp.lt.s32.totalorder %s48_s28, %s48_s28 }
  0x2d   :  { %p723_p5 = scmp.ne.s32.totalorder %s48_s28, %s722_s0  ;;  %p728_p7 = scmp.lt.s32.totalorder %s722_s0, %s722_s0 }
  0x2f   :  { %p729_p8 = por %p728_p7, %p727_p6 }
  0x31   :  { %p730_p9 = pnand %p729_p8, %p723_p5 }
  0x33   :  { %733 = shalt.err (!%p730_p9)
}
  0x34   :  { %53 = dma.hbm_to_vmem [thread:$0]  %s934_s3, 2048, %s48_s28, [#allocation6], %s788_s13, %s788_s13, %s789_s14  }
  0x35   :  { %s734_s20 = scalar_lea.hbm %s936_s5, 2048 }
  0x36   :  { %p735_p10 = scmp.ne.s32.totalorder %s936_s5, %s734_s20  ;;  %p738_p11 = scmp.lt.u32.totalorder %s734_s20, %s936_s5 }
  0x38   :  { %p740_p12 = pnand %p738_p11, %p735_p10 }
  0x3a   :  { %743 = shalt.err (!%p740_p12)
}
  0x3b   :  { %s744_s1 = scalar_lea.vmem %s870_s30, 2048  ;;  %p749_p0 = scmp.lt.s32.totalorder %s870_s30, %s870_s30 }
  0x3c   :  { %p745_p13 = scmp.ne.s32.totalorder %s870_s30, %s744_s1  ;;  %p750_p1 = scmp.lt.s32.totalorder %s744_s1, %s744_s1 }
  0x3e   :  { %p751_p2 = por %p750_p1, %p749_p0 }
  0x40   :  { %p752_p3 = pnand %p751_p2, %p745_p13 }
  0x42   :  { %755 = shalt.err (!%p752_p3)
}
  0x43   :  { %67 = dma.hbm_to_vmem [thread:$0]  %s936_s5, 2048, %s870_s30, [#allocation9], %s788_s13, %s788_s13, %s789_s14  }
  0x44   :  { %778 = dma.done.wait [#allocation3], 256  }
  0x45   :  { %779 = vsyncadd [#allocation3], 4294967040 }
  0x46   :  { %780 = dma.done.wait [#allocation6], 4096  }
  0x47   :  { %781 = vsyncadd [#allocation6], 4294963200 }
  0x48   :  { %782 = dma.done.wait [#allocation9], 2048  }
  0x49   :  { %783 = vsyncadd [#allocation9], 4294965248  ;;  %v84_v0 = vld [vmem:[#allocation5] sm:$0xff]  ;;  %v85_v1 = vld [vmem:[#allocation5 + $0x8] sm:$0xff]  ;;  %s792_s8 = smov [#allocation10]  }
  0x4a   :  { %v86_v2 = vld [vmem:[#allocation5 + $0x10] sm:$0xff]  ;;  %v565_v3 = vpack.c.bf16 %v85_v1, %v84_v0  ;;  %v87_v4 = vld [vmem:[#allocation5 + $0x18] sm:$0xff]  ;;  %v88_v6 = vld [vmem:[#allocation5 + $0x20] sm:$0xff]  ;;  %s389_s9 = sshll.u32 %s792_s8, 4  ;;  %s390_s9 = int_to_ptr.vmem [resolvable:$true] %s389_s9 }
  0x4b   :  { %v569_v5 = vpack.c.bf16 %v87_v4, %v86_v2  ;;  %v89_v7 = vld [vmem:[#allocation5 + $0x28] sm:$0xff]  ;;  %v90_v9 = vld [vmem:[#allocation5 + $0x30] sm:$0xff]  ;;  %v91_v10 = vld [vmem:[#allocation5 + $0x38] sm:$0xff]  ;;  %p761_p5 = scmp.lt.s32.totalorder %s390_s9, %s390_s9 }
  0x4c   :  { %566 = vmatprep.subr.bf16.mxu0 %v565_v3  ;;  %v573_v8 = vpack.c.bf16 %v89_v7, %v88_v6  ;;  %v82_v11 = vld [vmem:[#allocation2] sm:$0xff]  ;;  %v184_v12 = vld [vmem:[#allocation7] sm:$0xff]  ;;  %v185_v13 = vld [vmem:[#allocation7 + $0x8] sm:$0xff]  ;;  %v577_v20 = vpack.c.bf16 %v91_v10, %v90_v9 }
  0x4d   :  { %568 = vmatpush3.bf16.msra.mxu0 %v565_v3  ;;  %492 = vmatprep.mubr.f32.mxu0 %v82_v11  ;;  %v186_v14 = vld [vmem:[#allocation7 + $0x10] sm:$0xff]  ;;  %v597_v15 = vpack.c.bf16 %v185_v13, %v184_v12  ;;  %v187_v16 = vld [vmem:[#allocation7 + $0x18] sm:$0xff]  ;;  %v188_v18 = vld [vmem:[#allocation7 + $0x20] sm:$0xff] }
  0x4e   :  { %570 = vmatprep.subr.bf16.mxu0 %v569_v5  ;;  %v601_v17 = vpack.c.bf16 %v187_v16, %v186_v14  ;;  %v189_v19 = vld [vmem:[#allocation7 + $0x28] sm:$0xff]  ;;  %v92_v21 = vld [vmem:[#allocation5 + $0x40] sm:$0xff]  ;;  %v190_v24 = vld [vmem:[#allocation7 + $0x30] sm:$0xff] }
  0x4f   :  { %598 = vmatprep.subr.bf16.mxu1 %v597_v15  ;;  %v93_v22 = vld [vmem:[#allocation5 + $0x48] sm:$0xff]  ;;  %v605_v23 = vpack.c.bf16 %v189_v19, %v188_v18  ;;  %v191_v25 = vld [vmem:[#allocation7 + $0x38] sm:$0xff]  ;;  %v94_v27 = vld [vmem:[#allocation5 + $0x50] sm:$0xff] }
  0x50   :  { %600 = vmatpush3.bf16.msra.mxu1 %v597_v15  ;;  %v581_v26 = vpack.c.bf16 %v93_v22, %v92_v21  ;;  %v95_v28 = vld [vmem:[#allocation5 + $0x58] sm:$0xff]  ;;  %v609_v29 = vpack.c.bf16 %v191_v25, %v190_v24  ;;  %v192_v30 = vld [vmem:[#allocation7 + $0x40] sm:$0xff]  ;;  %v193_v31 = vld [vmem:[#allocation7 + $0x48] sm:$0xff] }
  0x51   :  { %572 = vmatpush3.bf16.msra.mxu0 %v569_v5  ;;  %602 = vmatprep.subr.bf16.mxu1 %v601_v17  ;;  %v585_v32 = vpack.c.bf16 %v95_v28, %v94_v27  ;;  %v96_v33 = vld [vmem:[#allocation5 + $0x60] sm:$0xff]  ;;  %v97_v34 = vld [vmem:[#allocation5 + $0x68] sm:$0xff]  ;;  %v613_v35 = vpack.c.bf16 %v193_v31, %v192_v30  ;;  %v194_v36 = vld [vmem:[#allocation7 + $0x50] sm:$0xff] }
  0x52   :  { %574 = vmatprep.subr.bf16.mxu0 %v573_v8  ;;  %v195_v37 = vld [vmem:[#allocation7 + $0x58] sm:$0xff]  ;;  %v589_v38 = vpack.c.bf16 %v97_v34, %v96_v33  ;;  %v98_v39 = vld [vmem:[#allocation5 + $0x70] sm:$0xff]  ;;  %v196_v42 = vld [vmem:[#allocation7 + $0x60] sm:$0xff] }
  0x53   :  { %v99_v40 = vld [vmem:[#allocation5 + $0x78] sm:$0xff]  ;;  %v617_v41 = vpack.c.bf16 %v195_v37, %v194_v36  ;;  %v197_v43 = vld [vmem:[#allocation7 + $0x68] sm:$0xff]  ;;  %v198_v47 = vld [vmem:[#allocation7 + $0x70] sm:$0xff] }
  0x54   :  { %604 = vmatpush3.bf16.msra.mxu1 %v601_v17  ;;  %v593_v44 = vpack.c.bf16 %v99_v40, %v98_v39  ;;  %v621_v45 = vpack.c.bf16 %v197_v43, %v196_v42  ;;  %v83_v46 = vld [vmem:[#allocation2 + $0x8] sm:$0xff]  ;;  %v284_v50 = vld [vmem:[#allocation8] sm:$0xff]  ;;  %v285_v51 = vld [vmem:[#allocation8 + $0x8] sm:$0xff] }
  0x55   :  { %576 = vmatpush3.bf16.msra.mxu0 %v573_v8  ;;  %606 = vmatprep.subr.bf16.mxu1 %v605_v23  ;;  %v199_v48 = vld [vmem:[#allocation7 + $0x78] sm:$0xff]  ;;  %v286_v52 = vld [vmem:[#allocation8 + $0x10] sm:$0xff]  ;;  %v629_v53 = vpack.c.bf16 %v285_v51, %v284_v50  ;;  %v288_v56 = vld [vmem:[#allocation8 + $0x20] sm:$0xff] }
  0x56   :  { %578 = vmatprep.subr.bf16.mxu0 %v577_v20  ;;  %v625_v49 = vpack.c.bf16 %v199_v48, %v198_v47  ;;  %v287_v54 = vld [vmem:[#allocation8 + $0x18] sm:$0xff]  ;;  %v289_v57 = vld [vmem:[#allocation8 + $0x28] sm:$0xff]  ;;  %v290_v59 = vld [vmem:[#allocation8 + $0x30] sm:$0xff] }
  0x57   :  { %v633_v55 = vpack.c.bf16 %v287_v54, %v286_v52  ;;  %v637_v58 = vpack.c.bf16 %v289_v57, %v288_v56  ;;  %v291_v60 = vld [vmem:[#allocation8 + $0x38] sm:$0xff]  ;;  %v292_v62 = vld [vmem:[#allocation8 + $0x40] sm:$0xff]  ;;  %v293_v63 = vld [vmem:[#allocation8 + $0x48] sm:$0xff] }
  0x58   :  { %608 = vmatpush3.bf16.msra.mxu1 %v605_v23  ;;  %v641_v61 = vpack.c.bf16 %v291_v60, %v290_v59  ;;  %v645_v0 = vpack.c.bf16 %v293_v63, %v292_v62  ;;  %v294_v1 = vld [vmem:[#allocation8 + $0x50] sm:$0xff]  ;;  %v295_v2 = vld [vmem:[#allocation8 + $0x58] sm:$0xff]  ;;  %v296_v4 = vld [vmem:[#allocation8 + $0x60] sm:$0xff] }
  0x59   :  { %580 = vmatpush3.bf16.msra.mxu0 %v577_v20  ;;  %610 = vmatprep.subr.bf16.mxu1 %v609_v29  ;;  %v649_v3 = vpack.c.bf16 %v295_v2, %v294_v1  ;;  %v297_v5 = vld [vmem:[#allocation8 + $0x68] sm:$0xff]  ;;  %v403_v7 = vld [vmem:[%s933_s2] ss:$0 sm:$0xff]  ;;  %v299_v15 = vld [vmem:[#allocation8 + $0x78] sm:$0xff] }
  0x5a   :  { %582 = vmatprep.subr.bf16.mxu0 %v581_v26  ;;  %v653_v6 = vpack.c.bf16 %v297_v5, %v296_v4  ;;  %v298_v14 = vld [vmem:[#allocation8 + $0x70] sm:$0xff] }
  0x5b   :  { %v657_v16 = vpack.c.bf16 %v299_v15, %v298_v14  ;;  %v404_v17 = vld [vmem:[%s935_s4] ss:$0 sm:$0xff]  ;;  %s756_s4 = scalar_lea.vmem %s390_s9, 256 }
  0x5c   :  { %612 = vmatpush3.bf16.msra.mxu1 %v609_v29  ;;  %v405_v24 = vld [vmem:[%s937_s6] ss:$0 sm:$0xff]  ;;  %p757_p4 = scmp.ne.s32.totalorder %s390_s9, %s756_s4  ;;  %p762_p6 = scmp.lt.s32.totalorder %s756_s4, %s756_s4 }
  0x5d   :  { %584 = vmatpush3.bf16.msra.mxu0 %v581_v26  ;;  %614 = vmatprep.subr.bf16.mxu1 %v613_v35 }
  0x5e   :  { %586 = vmatprep.subr.bf16.mxu0 %v585_v32  ;;  %p763_p7 = por %p762_p6, %p761_p5 }
  0x60   :  { %616 = vmatpush3.bf16.msra.mxu1 %v613_v35  ;;  %p764_p8 = pnand %p763_p7, %p757_p4 }
  0x61   :  { %588 = vmatpush3.bf16.msra.mxu0 %v585_v32  ;;  %618 = vmatprep.subr.bf16.mxu1 %v617_v41 }
  0x62   :  { %590 = vmatprep.subr.bf16.mxu0 %v589_v38 }
  0x64   :  { %620 = vmatpush3.bf16.msra.mxu1 %v617_v41 }
  0x65   :  { %592 = vmatpush3.bf16.msra.mxu0 %v589_v38  ;;  %622 = vmatprep.subr.bf16.mxu1 %v621_v45 }
  0x66   :  { %594 = vmatprep.subr.bf16.mxu0 %v593_v44 }
  0x68   :  { %624 = vmatpush3.bf16.msra.mxu1 %v621_v45 }
  0x69   :  { %596 = vmatpush3.bf16.msra.mxu0 %v593_v44  ;;  %626 = vmatprep.subr.bf16.mxu1 %v625_v49 }
  0x6a   :  { %630 = vmatprep.subr.bf16.mxu0 %v629_v53 }
  0x6c   :  { %493 = vmatmul.mubr.f32.vlgmr.msra.gmra.mrb[0].mxu0 %v83_v46  ;;  %628 = vmatpush3.bf16.msra.mxu1 %v625_v49 }
  0x6d   :  { %632 = vmatpush3.bf16.msra.mxu0 %v629_v53 }
  0x6e   :  { %634 = vmatprep.subr.bf16.mxu0 %v633_v55 }
  0x71   :  { %636 = vmatpush3.bf16.msra.mxu0 %v633_v55 }
  0x72   :  { %638 = vmatprep.subr.bf16.mxu0 %v637_v58 }
  0x75   :  { %640 = vmatpush3.bf16.msra.mxu0 %v637_v58 }
  0x76   :  { %642 = vmatprep.subr.bf16.mxu0 %v641_v61 }
  0x79   :  { %644 = vmatpush3.bf16.msra.mxu0 %v641_v61 }
  0x7a   :  { %646 = vmatprep.subr.bf16.mxu0 %v645_v0 }
  0x7d   :  { %648 = vmatpush3.bf16.msra.mxu0 %v645_v0 }
  0x7e   :  { %650 = vmatprep.subr.bf16.mxu0 %v649_v3 }
  0x81   :  { %652 = vmatpush3.bf16.msra.mxu0 %v649_v3 }
  0x82   :  { %654 = vmatprep.subr.bf16.mxu0 %v653_v6 }
  0x85   :  { %656 = vmatpush3.bf16.msra.mxu0 %v653_v6 }
  0x86   :  { %658 = vmatprep.subr.bf16.mxu0 %v657_v16 }
  0x89   :  { %660 = vmatpush3.bf16.msra.mxu0 %v657_v16 }
 0x13f   :  { %v494_v8 = vpop.f32.mrb[0].mxu0 }
 0x140   :  { %v179_v9 = vadd.f32 %v494_v8, %v403_v7  ;;  %v173_v10 = vpop.f32.mrb[1].mxu0 }
 0x141   :  { %v174_v11 = vadd.f32 %v403_v7, %v173_v10 }
 0x142   :  { %v183_v13 = vmax.f32 %v179_v9, 0.0 }
 0x143   :  { %v182_v12 = vmax.f32 %v174_v11, 0.0 }
 0x145   :  { %527 = vmatprep.mubr.f32.mxu1 %v182_v12 }
 0x146   :  { %528 = vmatmul.mubr.f32.vlgmr.msra.gmra.mrb[0].mxu1 %v183_v13 }
 0x219   :  { %v529_v18 = vpop.f32.mrb[0].mxu1 }
 0x21a   :  { %v279_v19 = vadd.f32 %v529_v18, %v404_v17  ;;  %v273_v20 = vpop.f32.mrb[1].mxu1 }
 0x21b   :  { %v274_v21 = vadd.f32 %v404_v17, %v273_v20 }
 0x21c   :  { %v283_v23 = vmax.f32 %v279_v19, 0.0 }
 0x21d   :  { %v282_v22 = vmax.f32 %v274_v21, 0.0 }
 0x21f   :  { %562 = vmatprep.mubr.f32.mxu0 %v282_v22 }
 0x220   :  { %563 = vmatmul.mubr.f32.vlgmr.msra.gmra.mrb[2].mxu0 %v283_v23 }
 0x2f3   :  { %v564_v25 = vpop.f32.mrb[2].mxu0 }
 0x2f4   :  { %v379_v26 = vadd.f32 %v564_v25, %v405_v24  ;;  %v373_v27 = vpop.f32.mrb[3].mxu0 }
 0x2f5   :  { %v374_v28 = vadd.f32 %v405_v24, %v373_v27 }
 0x2f6   :  { %383 = vst [vmem:[#allocation10 + $0x8] sm:$0xff] %v379_v26 }
 0x2f7   :  { %382 = vst [vmem:[#allocation10] sm:$0xff] %v374_v28 }
 0x2f8   :  { %767 = shalt.err (!%p764_p8)
}
 0x2f9   :  { %s768_s6 = scalar_lea.hbm %s938_s7, 256 }
 0x2fa   :  { %p769_p9 = scmp.ne.s32.totalorder %s938_s7, %s768_s6  ;;  %p772_p10 = scmp.lt.u32.totalorder %s768_s6, %s938_s7 }
 0x2fc   :  { %p774_p11 = pnand %p772_p10, %p769_p9 }
 0x2fe   :  { %777 = shalt.err (!%p774_p11)
}
 0x2ff   :  { %395 = dma.vmem_to_hbm [thread:$0]  %s390_s9, 256, %s938_s7, [#allocation4], %s788_s13, %s788_s13, %s789_s14  }
 0x300   :  { %784 = dma.done.wait [#allocation4], 256  }
 0x301   :  { %785 = vsyncadd [#allocation4], 4294967040 }
 0x302   :  { %399 = vsyncpa [#allocation3], 1 }
 0x303   :  { %400 = vsyncpa [#allocation6], 1 }
 0x304   :  { %401 = vsyncpa [#allocation9], 1 }
 0x305   :  { %402 = vsyncpa [#allocation4], 1 }

</bundles_post_ra>
